<compile_context>
chip_gen: v7x
topology: tpu7x:2x2x1
jax: 0.10.0
libtpu: 0.0.40
codegen_flags: <defaults>
</compile_context>

<pallas_src>
import jax
import jax.numpy as jnp
from jax.experimental import pallas as pl
from jax.experimental.pallas import tpu as pltpu


# ----------------------------- kernel bodies ---------------------------------

def _rope_block(x_ref, sin, cos, o_ref):
    # x_ref: (tile_h, tile_t, hs); sin/cos: (tile_t, hs) f32 (broadcast over heads).
    x = x_ref[...].astype(jnp.float32)           # rope_full_precision=True path
    half = x.shape[-1] // 2
    # [x1, x2] -> [x2, x1] via XLU lane rotation; sign folded into sin table.
    rotated = pltpu.roll(x, shift=half, axis=x.ndim - 1)
    o_ref[...] = (x * cos + rotated * sin).astype(o_ref.dtype)


def _rope_kernel_single(x_ref, sin_ref, cos_ref, o_ref):
    _rope_block(x_ref, sin_ref[...], cos_ref[...], o_ref)


def _rope_kernel_fused(q_ref, k_ref, sin_ref, cos_ref, qo_ref, ko_ref):
    sin = sin_ref[...]
    cos = cos_ref[...]
    _rope_block(q_ref, sin, cos, qo_ref)
    _rope_block(k_ref, sin, cos, ko_ref)


# ----------------------------- tiling helper ---------------------------------

def _sublane_align(dtype):
    """Sublane packing alignment for the second-to-last block dim."""
    return max(8, 32 // jnp.dtype(dtype).itemsize)   # f32:8, bf16:16, int8/fp8:32


def _pick_tiles(rows, seq_len, head_dim, itemsize, budget_bytes, align,
                seq_cap=1024):
    """Pick (tile_h, tile_t): moderate aligned seq tile first, then many heads."""
    # 1) Sequence tile: full T when small; else the largest align-multiple
    #    divisor of T not exceeding seq_cap.
    if seq_len <= seq_cap:
        tile_t = seq_len                              # full extent: always legal
    else:
        tile_t = None
        hi = min(seq_len, seq_cap)
        for cand in range(hi - hi % align, align - 1, -align):
            if seq_len % cand == 0:
                tile_t = cand
                break
        if tile_t is None:
            # TODO(synk): no aligned divisor under the cap (odd T); full T is
            # layout-legal but may exceed the budget for pathological lengths.
            tile_t = seq_len

    # 2) Row (head) tile: as many heads as fit the per-block byte budget,
    #    capped so the parallel row axis keeps >= 2 blocks (v7x dual-TC).
    block_row_bytes = max(1, tile_t * head_dim * itemsize)
    max_h = max(1, budget_bytes // block_row_bytes)
    if rows >= 2:
        max_h = min(max_h, rows // 2)
    tile_h = 1
    for cand in range(min(rows, max_h), 0, -1):
        if rows % cand == 0:
            tile_h = cand
            break
    return tile_h, tile_t


_COMPILER_PARAMS = pltpu.CompilerParams(
    dimension_semantics=("parallel", "parallel"),
    vmem_limit_bytes=48 * 1024 * 1024,   # <= v7x 64 MiB physical; fine on v5e/v6e
)


# ------------------------------- wrappers -------------------------------------

def _apply_rope_single(x, sin_signed, cos_full, budget_bytes=4 << 20):
    """x: (B, nh, T, hs); sin_signed/cos_full: (T, hs) float32."""
    B, nh, T, hs = x.shape
    rows = B * nh
    x3 = x.reshape(rows, T, hs)

    itemsize = jnp.dtype(x.dtype).itemsize           # budget against real dtype
    align = _sublane_align(x.dtype)
    tile_h, tile_t = _pick_tiles(rows, T, hs, itemsize, budget_bytes, align)
    grid = (T // tile_t, rows // tile_h)              # seq OUTER, rows INNER

    x_spec = pl.BlockSpec((tile_h, tile_t, hs), lambda t, r: (r, t, 0))
    tab_spec = pl.BlockSpec((tile_t, hs), lambda t, r: (t, 0))  # index only on seq
                                                                # -> refetch elided

    out3 = pl.pallas_call(
        _rope_kernel_single,
        out_shape=jax.ShapeDtypeStruct((rows, T, hs), x.dtype),
        grid_spec=pltpu.PrefetchScalarGridSpec(
            num_scalar_prefetch=0,
            grid=grid,
            in_specs=[x_spec, tab_spec, tab_spec],
            out_specs=x_spec,
        ),
        compiler_params=_COMPILER_PARAMS,
    )(x3, sin_signed, cos_full)
    return out3.reshape(B, nh, T, hs)


def _apply_rope_fused(q, k, sin_signed, cos_full, budget_bytes=2 << 20):
    """Fused q+k pass (q.shape == k.shape, shared table rows). No concat copy."""
    B, nh, T, hs = q.shape
    rows = B * nh
    q3 = q.reshape(rows, T, hs)
    k3 = k.reshape(rows, T, hs)

    itemsize = jnp.dtype(q.dtype).itemsize
    align = _sublane_align(q.dtype)
    tile_h, tile_t = _pick_tiles(rows, T, hs, itemsize, budget_bytes, align)
    grid = (T // tile_t, rows // tile_h)

    x_spec = pl.BlockSpec((tile_h, tile_t, hs), lambda t, r: (r, t, 0))
    tab_spec = pl.BlockSpec((tile_t, hs), lambda t, r: (t, 0))

    q_out3, k_out3 = pl.pallas_call(
        _rope_kernel_fused,
        out_shape=(jax.ShapeDtypeStruct((rows, T, hs), q.dtype),
                   jax.ShapeDtypeStruct((rows, T, hs), k.dtype)),
        grid_spec=pltpu.PrefetchScalarGridSpec(
            num_scalar_prefetch=0,
            grid=grid,
            in_specs=[x_spec, x_spec, tab_spec, tab_spec],
            out_specs=[x_spec, x_spec],
        ),
        compiler_params=_COMPILER_PARAMS,
    )(q3, k3, sin_signed, cos_full)
    return q_out3.reshape(q.shape), k_out3.reshape(k.shape)


def _rope_tables(seq_len, dim, rope_theta):
    """Build (sin_signed, cos_full) float32 tables of shape (seq_len, dim)."""
    inv_freq = 1.0 / (rope_theta ** (jnp.arange(0, dim, 2, dtype=jnp.float32) / dim))
    seq = jnp.arange(seq_len, dtype=jnp.float32)
    freqs = seq[:, None] * inv_freq[None, :]                      # (T, dim/2)
    sin_h = jnp.sin(freqs)
    cos_h = jnp.cos(freqs)
    cos_full = jnp.concatenate([cos_h, cos_h], axis=-1)           # (T, dim)
    # Sign folded in so the kernel can use a plain lane-rotate instead of
    # rotate_half's slice/negate/concat:  rotate_half(t)*sin == roll(t)*sin_signed
    sin_signed = jnp.concatenate([-sin_h, sin_h], axis=-1)        # (T, dim)
    return sin_signed, cos_full


def rotary_embedding_forward(q, k, rope_theta=10000.0, block_end_index=None):
    """Mirrors RotaryEmbedding.forward(q, k) with rope_full_precision=True.

    q: (B, n_heads, query_len, hs), k: (B, n_kv_heads, key_len, hs).
    Returns (q_rotated, k_rotated) in the input dtypes.
    """
    hs = q.shape[-1]
    assert k.shape[-1] == hs and hs % 2 == 0
    query_len = q.shape[-2]
    key_len = k.shape[-2]

    if block_end_index is None:
        end = key_len
    else:
        # TODO(synk): only a static Python int offset is supported here
        # (PyTorch uses block_end_index.item(), i.e. a host scalar anyway).
        end = int(block_end_index)
        if end < query_len:
            raise ValueError("block_end_index must be >= query_len "
                             f"(got end={end}, query_len={query_len})")
    table_len = max(key_len, end)

    sin_signed, cos_full = _rope_tables(table_len, hs, rope_theta)

    # Standard prefill path: one fused kernel (shared table rows, one launch).
    if (q.shape == k.shape and q.dtype == k.dtype
            and query_len == key_len and end == key_len):
        return _apply_rope_fused(q, k, sin_signed, cos_full)

    # General path (GQA head counts, q offset): two independent passes.
    q_out = _apply_rope_single(q, sin_signed[end - query_len:end],
                               cos_full[end - query_len:end])
    k_out = _apply_rope_single(k, sin_signed[:key_len], cos_full[:key_len])
    return q_out, k_out


# ------------------------------ reference -------------------------------------

def _rope_reference(q, k, rope_theta, block_end_index=None):
    hs = q.shape[-1]
    query_len, key_len = q.shape[-2], k.shape[-2]
    end = key_len if block_end_index is None else int(block_end_index)
    table_len = max(key_len, end)

    inv_freq = 1.0 / (rope_theta ** (jnp.arange(0, hs, 2, dtype=jnp.float32) / hs))
    seq = jnp.arange(table_len, dtype=jnp.float32)
    freqs = jnp.einsum("i,j->ij", seq, inv_freq)
    positions = jnp.concatenate([freqs, freqs], axis=-1)
    pos_sin = jnp.sin(positions)[None, None]
    pos_cos = jnp.cos(positions)[None, None]

    def rotate_half(x):
        B, nh, T, d = x.shape
        xv = x.reshape(B, nh, T, 2, d // 2)
        x1, x2 = xv[..., 0, :], xv[..., 1, :]
        return jnp.concatenate([-x2, x1], axis=-1)

    def apply(sin, cos, t):
        return t * cos + rotate_half(t) * sin

    qf, kf = q.astype(jnp.float32), k.astype(jnp.float32)
    q_out = apply(pos_sin[:, :, end - query_len:end, :],
                  pos_cos[:, :, end - query_len:end, :], qf)
    k_out = apply(pos_sin[:, :, :key_len, :], pos_cos[:, :, :key_len, :], kf)
    return q_out.astype(q.dtype), k_out.astype(k.dtype)


# --------------------------------- main ----------------------------------------

if __name__ == "__main__":
    key = jax.random.PRNGKey(0)
    kq, kk, kq2 = jax.random.split(key, 3)

    batch, n_heads, seq_len, head_dim = 2, 4, 8, 32
    q = jax.random.normal(kq, (batch, n_heads, seq_len, head_dim), dtype=jnp.float32)
    k = jax.random.normal(kk, (batch, n_heads, seq_len, head_dim), dtype=jnp.float32)

    ok = True

    # Case 1: query_len == key_len (standard prefill) -> fused q+k kernel.
    q_out, k_out = rotary_embedding_forward(q, k, rope_theta=10000.0)
    q_out, k_out = jax.block_until_ready(q_out), jax.block_until_ready(k_out)
    q_ref, k_ref = _rope_reference(q, k, 10000.0)
    if not (jnp.allclose(q_out, q_ref, atol=1e-5, rtol=1e-5)
            and jnp.allclose(k_out, k_ref, atol=1e-5, rtol=1e-5)):
        ok = False
        print("MISMATCH (fused case): q err",
              float(jnp.max(jnp.abs(q_out - q_ref))), " k err",
              float(jnp.max(jnp.abs(k_out - k_ref))))

    # Case 2: query_len < key_len (positional offset path for q) -> two passes.
    q_short = jax.random.normal(kq2, (batch, n_heads, 4, head_dim), dtype=jnp.float32)
    q2_out, k2_out = rotary_embedding_forward(q_short, k, rope_theta=10000.0)
    q2_out, k2_out = jax.block_until_ready(q2_out), jax.block_until_ready(k2_out)
    q2_ref, k2_ref = _rope_reference(q_short, k, 10000.0)
    if not (jnp.allclose(q2_out, q2_ref, atol=1e-5, rtol=1e-5)
            and jnp.allclose(k2_out, k2_ref, atol=1e-5, rtol=1e-5)):
        ok = False
        print("MISMATCH (offset case): q err",
              float(jnp.max(jnp.abs(q2_out - q2_ref))), " k err",
              float(jnp.max(jnp.abs(k2_out - k2_ref))))

    # Case 3: bf16 inputs (dtype-aligned tiling, f32 compute, bf16 store).
    qb, kb = q.astype(jnp.bfloat16), k.astype(jnp.bfloat16)
    qb_out, kb_out = rotary_embedding_forward(qb, kb, rope_theta=10000.0)
    qb_out, kb_out = jax.block_until_ready(qb_out), jax.block_until_ready(kb_out)
    qb_ref, kb_ref = _rope_reference(qb, kb, 10000.0)
    if not (jnp.allclose(qb_out.astype(jnp.float32), qb_ref.astype(jnp.float32),
                         atol=2e-2, rtol=2e-2)
            and jnp.allclose(kb_out.astype(jnp.float32), kb_ref.astype(jnp.float32),
                             atol=2e-2, rtol=2e-2)):
        ok = False
        print("MISMATCH (bf16 case)")

    if ok:
        print("KERNEL_OK")
</pallas_src>

<mosaic_0001>
module attributes {stable_mosaic.version = 11 : i64} {
  func.func @_rope_kernel_fused(%arg0: i32, %arg1: i32, %arg2: memref<4x8x32xf32, #tpu.memory_space<vmem>>, %arg3: memref<4x8x32xf32, #tpu.memory_space<vmem>>, %arg4: memref<8x32xf32, #tpu.memory_space<vmem>>, %arg5: memref<8x32xf32, #tpu.memory_space<vmem>>, %arg6: memref<4x8x32xf32, #tpu.memory_space<vmem>>, %arg7: memref<4x8x32xf32, #tpu.memory_space<vmem>>) attributes {dimension_semantics = [#tpu.dimension_semantics<parallel>, #tpu.dimension_semantics<parallel>], iteration_bounds = array<i64: 1, 2>, scalar_prefetch = 0 : i64, scratch_operands = 0 : i64, tpu.core_type = #tpu.core_type<tc>, window_params = [{transform_indices = @transform_0, window_bounds = array<i64: 4, 8, 32>}, {transform_indices = @transform_1, window_bounds = array<i64: 4, 8, 32>}, {transform_indices = @transform_2, window_bounds = array<i64: 8, 32>}, {transform_indices = @transform_3, window_bounds = array<i64: 8, 32>}, {transform_indices = @transform_4, window_bounds = array<i64: 4, 8, 32>}, {transform_indices = @transform_5, window_bounds = array<i64: 4, 8, 32>}]} {
    %c0 = arith.constant 0 : index
    %c0_0 = arith.constant 0 : index
    %0 = vector.load %arg4[%c0, %c0_0] : memref<8x32xf32, #tpu.memory_space<vmem>>, vector<8x32xf32>
    %c0_1 = arith.constant 0 : index
    %c0_2 = arith.constant 0 : index
    %1 = vector.load %arg5[%c0_1, %c0_2] : memref<8x32xf32, #tpu.memory_space<vmem>>, vector<8x32xf32>
    %c0_3 = arith.constant 0 : index
    %c0_4 = arith.constant 0 : index
    %c0_5 = arith.constant 0 : index
    %2 = vector.load %arg2[%c0_3, %c0_4, %c0_5] : memref<4x8x32xf32, #tpu.memory_space<vmem>>, vector<4x8x32xf32>
    %c16_i32 = arith.constant 16 : i32
    %3 = tpu.dynamic_rotate %2 by %c16_i32 dim 2 : vector<4x8x32xf32>, i32 -> vector<4x8x32xf32>
    %4 = vector.shape_cast %1 : vector<8x32xf32> to vector<1x8x32xf32>
    %5 = vector.broadcast %4 : vector<1x8x32xf32> to vector<4x8x32xf32>
    %6 = arith.mulf %2, %5 : vector<4x8x32xf32>
    %7 = vector.shape_cast %0 : vector<8x32xf32> to vector<1x8x32xf32>
    %8 = vector.broadcast %7 : vector<1x8x32xf32> to vector<4x8x32xf32>
    %9 = arith.mulf %3, %8 : vector<4x8x32xf32>
    %10 = arith.addf %6, %9 : vector<4x8x32xf32>
    %c0_6 = arith.constant 0 : index
    %c0_7 = arith.constant 0 : index
    %c0_8 = arith.constant 0 : index
    %11 = vector.load %arg6[%c0_6, %c0_7, %c0_8] : memref<4x8x32xf32, #tpu.memory_space<vmem>>, vector<4x8x32xf32>
    tpu.vector_store %arg6[%c0_6, %c0_7, %c0_8], %10 {strides = array<i32>} : memref<4x8x32xf32, #tpu.memory_space<vmem>>, vector<4x8x32xf32>,
    %c0_9 = arith.constant 0 : index
    %c0_10 = arith.constant 0 : index
    %c0_11 = arith.constant 0 : index
    %12 = vector.load %arg3[%c0_9, %c0_10, %c0_11] : memref<4x8x32xf32, #tpu.memory_space<vmem>>, vector<4x8x32xf32>
    %c16_i32_12 = arith.constant 16 : i32
    %13 = tpu.dynamic_rotate %12 by %c16_i32_12 dim 2 : vector<4x8x32xf32>, i32 -> vector<4x8x32xf32>
    %14 = vector.shape_cast %1 : vector<8x32xf32> to vector<1x8x32xf32>
    %15 = vector.broadcast %14 : vector<1x8x32xf32> to vector<4x8x32xf32>
    %16 = arith.mulf %12, %15 : vector<4x8x32xf32>
    %17 = vector.shape_cast %0 : vector<8x32xf32> to vector<1x8x32xf32>
    %18 = vector.broadcast %17 : vector<1x8x32xf32> to vector<4x8x32xf32>
    %19 = arith.mulf %13, %18 : vector<4x8x32xf32>
    %20 = arith.addf %16, %19 : vector<4x8x32xf32>
    %c0_13 = arith.constant 0 : index
    %c0_14 = arith.constant 0 : index
    %c0_15 = arith.constant 0 : index
    %21 = vector.load %arg7[%c0_13, %c0_14, %c0_15] : memref<4x8x32xf32, #tpu.memory_space<vmem>>, vector<4x8x32xf32>
    tpu.vector_store %arg7[%c0_13, %c0_14, %c0_15], %20 {strides = array<i32>} : memref<4x8x32xf32, #tpu.memory_space<vmem>>, vector<4x8x32xf32>,
    return
  }
  func.func @transform_0(%arg0: i32, %arg1: i32) -> (i32, i32, i32) {
    %c0_i32 = arith.constant 0 : i32
    %c0_i32_0 = arith.constant 0 : i32
    return %arg1, %arg0, %c0_i32 : i32, i32, i32
  }
  func.func @transform_1(%arg0: i32, %arg1: i32) -> (i32, i32, i32) {
    %c0_i32 = arith.constant 0 : i32
    %c0_i32_0 = arith.constant 0 : i32
    return %arg1, %arg0, %c0_i32 : i32, i32, i32
  }
  func.func @transform_2(%arg0: i32, %arg1: i32) -> (i32, i32) {
    %c0_i32 = arith.constant 0 : i32
    %c0_i32_0 = arith.constant 0 : i32
    return %arg0, %c0_i32 : i32, i32
  }
  func.func @transform_3(%arg0: i32, %arg1: i32) -> (i32, i32) {
    %c0_i32 = arith.constant 0 : i32
    %c0_i32_0 = arith.constant 0 : i32
    return %arg0, %c0_i32 : i32, i32
  }
  func.func @transform_4(%arg0: i32, %arg1: i32) -> (i32, i32, i32) {
    %c0_i32 = arith.constant 0 : i32
    %c0_i32_0 = arith.constant 0 : i32
    return %arg1, %arg0, %c0_i32 : i32, i32, i32
  }
  func.func @transform_5(%arg0: i32, %arg1: i32) -> (i32, i32, i32) {
    %c0_i32 = arith.constant 0 : i32
    %c0_i32_0 = arith.constant 0 : i32
    return %arg1, %arg0, %c0_i32 : i32, i32, i32
  }
}

</mosaic_0001>

<bundles_post_ra>
// kernel: tpu_custom_call.1
= control target key start
LH: loop header
LB: loop body
LE: loop exit
PB: predicated region body
PF: predicated region fallthrough
CT: control target
= control target key end

     0   :  { %s1477_s0 = inlined_call_operand.hbm [shape: f32[8,8,32], index: 0, kind: input, shape index: {}]   ;;  %s1478_s1 = inlined_call_operand.hbm [shape: f32[8,8,32], index: 1, kind: input, shape index: {}]   ;;  %s1479_s2 = inlined_call_operand.hbm [shape: f32[8,32], index: 2, kind: input, shape index: {}]   ;;  %s1480_s3 = inlined_call_operand.vmem [shape: f32[8,32], index: 3, kind: input, shape index: {}]   ;;  %s1481_s4 = inlined_call_operand.hbm [shape: f32[8,8,32], index: 4, kind: output, shape index: {0}]   ;;  %s1482_s5 = inlined_call_operand.hbm [shape: f32[8,8,32], index: 5, kind: output, shape index: {1}]  }
   0x1   :  { %1490 = sst [smem:[#allocation18_spill]] %s1477_s0 }
   0x2   :  { %1491 = sst [smem:[#allocation19_spill]] %s1479_s2 }
   0x3   :  { %11 = vsyncpa [#allocation3], 0 }
   0x4   :  { %13 = vsyncpa [#allocation3 + $0x1], 0 }
   0x5   :  { %14 = vsyncpa [#allocation6], 0 }
   0x6   :  { %16 = vsyncpa [#allocation6 + $0x1], 0 }
   0x7   :  { %17 = vsyncpa [#allocation4], 0 }
   0x8   :  { %19 = vsyncpa [#allocation4 + $0x1], 0 }
   0x9   :  { %20 = vsyncpa [#allocation10], 0 }
   0xa   :  { %22 = vsyncpa [#allocation10 + $0x1], 0  ;;  %s1065_s18 = smov 0   ;;  %s1067_s19 = smov 0  }
   0xb   :  { %s1069_s20 = smov 0   ;;  %s1071_s21 = smov 0  }
   0xc   :  { %s1073_s22 = smov 0   ;;  %s1075_s23 = smov 0  }
   0xd LB: > { %s1096_s24 = sadd.s32 4294967295, %s1021_s23   ;;  %s692_s25 = sadd.s32 4294967294, %s1021_s23   ;;  %s1021_s23 = sphi %s1075_s23, %s28_s23   ;;  %s1017_s22 = sphi %s1073_s22, %s1521_s22   ;;  %s1013_s21 = sphi %s1071_s21, %s1520_s21   ;;  %s1009_s20 = sphi %s1069_s20, %s1519_s20   ;;  %s1005_s19 = sphi %s1067_s19, %s1518_s19   ;;  %s1001_s18 = sphi %s1065_s18, %s1517_s18  }
   0xe   : > { %p56_p0 = scmp.ne.s32.totalorder %s1009_s20, %s1005_s19  ;;  %p57_p1 = scmp.eq.s32.totalorder %s1021_s23, 0 }
   0xf   : > { %p62_p2 = scmp.ne.s32.totalorder %s1005_s19, %s1001_s18  ;;  %p1483_p3 = scmp.eq.s32.totalorder %s1096_s24, 0 }
  0x10   : > { %p168_p4 = scmp.eq.s32.totalorder %s1096_s24, 1  ;;  %p1107_p5 = por %p57_p1, %p56_p0 }
  0x11   : > { %p174_p6 = scmp.eq.s32.totalorder %s692_s25, 1  ;;  %p1113_p7 = por %p1483_p3, %p62_p2 }
  0x12   : > { %p1117_p8 = por %p168_p4, %p56_p0  ;;  %p693_p10 = scmp.ge.s32.totalorder %s1021_s23, 1 }
  0x13   : > { %s1493_s28 = scalar_select %p1113_p7, 1, 0 }
  0x14   : > { %s1494_s29 = scalar_select %p1117_p8, 1, 0 }
  0x15   : > { %p1121_p9 = por %p174_p6, %p62_p2  ;;  %p209_p11 = scmp.lt.s32.totalorder %s1021_s23, 3 }
  0x16   : > { %s1023_s7 = smov [#allocation7]   ;;  %p752_p1 = scmp.lt.s32.totalorder %s1021_s23, 2 }
  0x17   : > { %s1495_s30 = scalar_select %p1121_p9, 1, 0 }
  0x18   : > { %p1128_p13 = pnand %p693_p10, %p209_p11  ;;  %s224_s8 = sshll.u32 %s1023_s7, 4  ;;  %s225_s8 = int_to_ptr.vmem [resolvable:$true] %s224_s8 }
  0x19   : > { %p1137_p4 = pnand %p752_p1, %p1107_p5  ;;  %s37_s11 = sadd.s32 1, %s1017_s22 }
  0x1a   : > { %s1496_s6 = scalar_select %p1128_p13, 1, 0 }
  0x1b   : > { %p733_p0 = pneg %p1128_p13  ;;  %p1148_p6 = scmp.ge.s32.totalorder %s37_s11, 2 }
  0x1c   : > { %s1497_s9 = scalar_select %p1137_p4, 1, 0 }
  0x1d   : > { %p1143_p2 = pnand %p733_p0, %p1483_p3  ;;  %s242_s13 = sand.u32 1, %s1009_s20  }
  0x1e   : > { %s1499_s12 = scalar_select %p1148_p6, 1, 0 }
  0x1f   : > { %s1500_s2 = sld [smem:[#allocation19_spill]]  ;;  %p813_p10 = pneg %p1143_p2 }
  0x25   : > { %s811_s16 = scalar_lea.hbm %s1500_s2, 128 }
  0x26   : > { %p812_p5 = scmp.ne.s32.totalorder %s1500_s2, %s811_s16  ;;  %p818_p0 = scmp.lt.u32.totalorder %s811_s16, %s1500_s2 }
  0x28   : > { %p814_p11 = pnand %p813_p10, %p812_p5 }
  0x2a   : > { %p815_p1 = pneg %p814_p11 }
  0x2c   : > { %p820_p12 = pnand %p818_p0, %p815_p1 }
  0x2e   : > { %823 = shalt.err (!%p820_p12)
}
  0x2f   : > { %s824_s26 = scalar_lea.vmem %s225_s8, 128  ;;  %p832_p7 = scmp.lt.s32.totalorder %s225_s8, %s225_s8 }
  0x30   : > { %p825_p3 = scmp.ne.s32.totalorder %s225_s8, %s824_s26  ;;  %p833_p13 = scmp.lt.s32.totalorder %s824_s26, %s824_s26 }
  0x32   : > { %p827_p9 = pnand %p825_p3, %p813_p10  ;;  %p834_p4 = por %p833_p13, %p832_p7 }
  0x34   : > { %p828_p8 = pneg %p827_p9 }
  0x36   : > { %p835_p6 = pnand %p834_p4, %p828_p8 }
  0x38   : > { %838 = shalt.err (!%p835_p6)
}
  0x39   : > { %736 = dma.hbm_to_vmem [thread:$0]  (!%p1143_p2), %s1500_s2, 128, %s225_s8, [#allocation6]  }
  0x3a   : > { %p1501_p3 = scmp.ne.s32.totalorder %s1499_s12, 0  ;;  %s1173_s26 = sshll.u32 %s242_s13, 5 }
  0x3b   : > { %s1488_s16 = sshll.u32 %s1017_s22, 9  ;;  %s1503_s0 = sld [smem:[#allocation18_spill]] }
  0x3c   : > { %s1523_s11 = smov (%p1501_p3, %s37_s11), 0  ;;  %s246_s8 = scalar_lea.vmem [#allocation2], %s1173_s26 }
  0x3d   : > { %1502 = sst [smem:[#allocation16_spill]] %s1523_s11  ;;  %s44_s10 = ssub.s32 %s1017_s22, %s1523_s11 }
  0x3e   : > { %p47_p7 = scmp.eq.s32.totalorder %s44_s10, 0  ;;  %s254_s12 = sshll.u32 %s246_s8, 4  ;;  %s1191_s12 = int_to_ptr.vmem [resolvable:$true] %s254_s12 }
  0x3f   : > { %s1504_s7 = sadd.s32 1, %s1009_s20  ;;  %s1193_s15 = scalar_lea.sflag [#allocation3], %s242_s13 }
  0x40   : > { %s1189_s14 = scalar_select %p47_p7, %s1009_s20, %s1504_s7  }
  0x41   : > { %s1183_s27 = scalar_lea.hbm %s1503_s0, %s1488_s16  ;;  %p1506_p9 = scmp.ne.s32.totalorder %s1497_s9, 0 }
  0x42   : > { %1505 = sst [smem:[#allocation17_spill]] %s1189_s14  ;;  %s839_s10 = scalar_lea.hbm %s1183_s27, 512 }
  0x43   : > { %p840_p8 = scmp.ne.s32.totalorder %s1183_s27, %s839_s10  ;;  %p841_p12 = pneg %p1506_p9 }
  0x44   : > { %s844_s16 = scalar_lea.hbm %s1503_s0, 1024  ;;  %p845_p2 = scmp.lt.u32.totalorder %s1183_s27, %s1503_s0 }
  0x45   : > { %p842_p13 = pnand %p841_p12, %p840_p8  ;;  %p846_p6 = scmp.lt.u32.totalorder %s844_s16, %s839_s10 }
  0x46   : > { %p848_p10 = scmp.lt.u32.totalorder %s839_s10, %s1183_s27 }
  0x47   : > { %p843_p4 = pneg %p842_p13  ;;  %p847_p5 = por %p846_p6, %p845_p2 }
  0x49   : > { %p849_p11 = por %p848_p10, %p847_p5 }
  0x4b   : > { %p850_p1 = pnand %p849_p11, %p843_p4 }
  0x4d   : > { %853 = shalt.err (!%p850_p1)
}
  0x4e   : > { %s854_s13 = scalar_lea.vmem %s1191_s12, 512  ;;  %s1024_s7 = smov [#allocation2]  }
  0x4f   : > { %p855_p0 = scmp.ne.s32.totalorder %s1191_s12, %s854_s13  ;;  %s859_s17 = sshll.u32 %s1024_s7, 4  ;;  %s860_s17 = int_to_ptr.vmem [resolvable:$false] %s859_s17 }
  0x50   : > { %s861_s2 = scalar_lea.vmem %s860_s17, 1024  ;;  %p862_p8 = scmp.lt.s32.totalorder %s1191_s12, %s860_s17 }
  0x51   : > { %p857_p3 = pnand %p855_p0, %p841_p12  ;;  %p863_p13 = scmp.lt.s32.totalorder %s861_s2, %s854_s13 }
  0x53   : > { %p858_p7 = pneg %p857_p3  ;;  %p864_p2 = por %p863_p13, %p862_p8 }
  0x55   : > { %p865_p6 = pnand %p864_p2, %p858_p7 }
  0x57   : > { %868 = shalt.err (!%p865_p6)
}
  0x58   : > { %s1025_s16 = smov 128   ;;  %s1026_s10 = smov 8  }
  0x59   : > { %740 = dma.hbm_to_vmem [thread:$0]  (!%p1506_p9), %s1183_s27, 512, %s1191_s12, %s1193_s15, %s1025_s16, %s1025_s16, %s1026_s10  }
  0x5a   : > { %s1507_s25 = sshll.u32 %s1017_s22, 9  ;;  %s268_s17 = scalar_lea.vmem [#allocation5], %s1173_s26 }
  0x5b   : > { %s1229_s7 = scalar_lea.hbm %s1478_s1, %s1507_s25  ;;  %s276_s2 = sshll.u32 %s268_s17, 4  ;;  %s1232_s2 = int_to_ptr.vmem [resolvable:$true] %s276_s2 }
  0x5c   : > { %s264_s0 = sand.u32 1, %s1021_s23   ;;  %s869_s14 = scalar_lea.hbm %s1229_s7, 512 }
  0x5d   : > { %s1235_s11 = scalar_lea.sflag [#allocation6], %s264_s0  ;;  %p870_p4 = scmp.ne.s32.totalorder %s1229_s7, %s869_s14 }
  0x5e   : > { %s874_s15 = scalar_lea.hbm %s1478_s1, 1024  ;;  %p875_p11 = scmp.lt.u32.totalorder %s1229_s7, %s1478_s1 }
  0x5f   : > { %p872_p5 = pnand %p870_p4, %p841_p12  ;;  %p876_p1 = scmp.lt.u32.totalorder %s874_s15, %s869_s14 }
  0x60   : > { %p878_p3 = scmp.lt.u32.totalorder %s869_s14, %s1229_s7 }
  0x61   : > { %p873_p10 = pneg %p872_p5  ;;  %p877_p0 = por %p876_p1, %p875_p11 }
  0x63   : > { %p879_p7 = por %p878_p3, %p877_p0 }
  0x65   : > { %p880_p8 = pnand %p879_p7, %p873_p10 }
  0x67   : > { %883 = shalt.err (!%p880_p8)
}
  0x68   : > { %s884_s0 = scalar_lea.vmem %s1232_s2, 512  ;;  %s1027_s26 = smov [#allocation5]  }
  0x69   : > { %p885_p13 = scmp.ne.s32.totalorder %s1232_s2, %s884_s0  ;;  %s889_s13 = sshll.u32 %s1027_s26, 4  ;;  %s890_s13 = int_to_ptr.vmem [resolvable:$false] %s889_s13 }
  0x6a   : > { %s891_s17 = scalar_lea.vmem %s890_s13, 1024  ;;  %p892_p4 = scmp.lt.s32.totalorder %s1232_s2, %s890_s13 }
  0x6b   : > { %p887_p2 = pnand %p885_p13, %p841_p12  ;;  %p893_p5 = scmp.lt.s32.totalorder %s891_s17, %s884_s0 }
  0x6d   : > { %p888_p6 = pneg %p887_p2  ;;  %p894_p11 = por %p893_p5, %p892_p4 }
  0x6f   : > { %p895_p1 = pnand %p894_p11, %p888_p6 }
  0x71   : > { %898 = shalt.err (!%p895_p1)
}
  0x72   : > { %743 = dma.hbm_to_vmem [thread:$0]  (!%p1506_p9), %s1229_s7, 512, %s1232_s2, %s1235_s11, %s1025_s16, %s1025_s16, %s1026_s10  }
  0x73   : > { %p1508_p12 = scmp.ne.s32.totalorder %s1496_s6, 0 }
  0x74   : > { %s1267_s14 = sand.u32 (!%p1508_p12), 1, %s1005_s19   ;;  %p1509_p10 = scmp.ne.s32.totalorder (!%p1508_p12), %s1493_s28, 0 }
  0x75   : > { %288 = sbr.rel (%p1508_p12) target bundleno = 542 (0x21e), region = 36  ;;  %s1270_s27 = sshll.u32 (!%p1508_p12), %s1267_s14, 5 }
  0x76   : > { %s291_s9 = scalar_lea.sflag (!%p1508_p12), [#allocation3], %s1267_s14  ;;  %s294_s12 = scalar_lea.vmem (!%p1508_p12), [#allocation2], %s1270_s27 }
  0x7c   : > { %980 = dma.done.wait (%p1509_p10), %s291_s9, 512  }
  0x7d   : > { %982 = vsyncadd (%p1509_p10), %s291_s9, 4294966784  ;;  %s299_s6 = sand.u32 1, %s1096_s24   ;;  %s303_s16 = scalar_lea.vmem [#allocation5], %s1270_s27 }
  0x7e   : > { %s300_s11 = scalar_lea.sflag [#allocation6], %s299_s6 }
  0x7f   : > { %984 = dma.done.wait (%p1509_p10), %s300_s11, 512  }
  0x80   : > { %986 = vsyncadd (%p1509_p10), %s300_s11, 4294966784  ;;  %p1510_p9 = scmp.eq.s32.totalorder %s1096_s24, 0 }
  0x82   : > { %988 = dma.done.wait (%p1510_p9), [#allocation6], 128   ;;  %p1511_p0 = pmov %p1510_p9 }
  0x83   : > { %v1288_v0 = vld [vmem:[%s294_s12] sm:$0xff]  ;;  %v1290_v1 = vld [vmem:[%s294_s12 + $0x10] sm:$0xff]  ;;  %s1028_s10 = smov 32   ;;  %v1296_v2 = vld [vmem:[%s294_s12 + $0x8] sm:$0xff]  ;;  %vm362_vm0 = vcmask 1047808   ;;  %s1029_s24 = smov 16  }
  0x84   : > { %990 = vsyncadd (%p1511_p0), [#allocation6], 4294967168  ;;  %363 = vrot.lane.b32.xlu0 %v1288_v0, %s1028_s10  ;;  %369 = vrot.lane.b32.xlu1 %v1290_v1, %s1028_s10  ;;  %v1298_v3 = vld [vmem:[%s294_s12 + $0x18] sm:$0xff]  ;;  %v1304_v4 = vld [vmem:[%s303_s16] sm:$0xff]  ;;  %s1030_s28 = smov 112   ;;  %vm419_vm1 = vcmask 261120  }
  0x85   : > { %v1306_v5 = vld [vmem:[%s303_s16 + $0x8] sm:$0xff]  ;;  %v1312_v6 = vld [vmem:[%s303_s16 + $0x10] sm:$0xff]  ;;  %v1314_v7 = vld [vmem:[%s303_s16 + $0x18] sm:$0xff]  ;;  %s340_s15 = scalar_lea.vmem [#allocation8], %s1270_s27  ;;  %s719_s8 = sshll.u32 %s1013_s21, 9 }
  0x86   : > { %v356_v24 = vld [vmem:[#allocation7] sm:$0xff]  ;;  %s504_s25 = sshll.u32 %s340_s15, 4  ;;  %s1378_s13 = scalar_lea.hbm %s1481_s4, %s719_s8  ;;  %s1369_s25 = int_to_ptr.vmem [resolvable:$true] %s504_s25 }
  0x87   : > { %v357_v50 = vld [vmem:[%s1480_s3] sm:$0xff]  ;;  %s485_s17 = scalar_lea.sflag [#allocation4], %s1267_s14  ;;  %s899_s9 = scalar_lea.vmem %s1369_s25, 512 }
  0x88   : > { %366 = vrot.lane.b32.xlu0 %v1296_v2, %s1028_s10  ;;  %372 = vrot.lane.b32.xlu1 %v1298_v3, %s1028_s10  ;;  %v388_v51 = vmul.f32 %v1296_v2, %v357_v50  ;;  %v387_v52 = vmul.f32 %v1288_v0, %v357_v50  ;;  %v390_v57 = vmul.f32 %v1298_v3, %v357_v50  ;;  %p900_p3 = scmp.ne.s32.totalorder %s1369_s25, %s899_s9  ;;  %p1512_p7 = scmp.ne.s32.totalorder %s1494_s29, 0 }
  0x89   : > { %v389_v58 = vmul.f32 %v1290_v1, %v357_v50  ;;  %v453_v63 = vmul.f32 %v1306_v5, %v357_v50  ;;  %s1031_s12 = smov [#allocation8]  }
  0x8a   : > { %p901_p8 = pnand %p900_p3, %p1512_p7  ;;  %s903_s6 = sshll.u32 %s1031_s12, 4  ;;  %s904_s6 = int_to_ptr.vmem [resolvable:$false] %s903_s6 }
  0x8b   : > { %s905_s11 = scalar_lea.vmem %s904_s6, 1024  ;;  %p906_p2 = scmp.lt.s32.totalorder %s1369_s25, %s904_s6 }
  0x8c   : > { %428 = vrot.lane.b32.xlu0 %v1304_v4, %s1028_s10  ;;  %431 = vrot.lane.b32.xlu1 %v1306_v5, %s1028_s10  ;;  %p902_p13 = pneg %p901_p8  ;;  %p907_p6 = scmp.lt.s32.totalorder %s905_s11, %s899_s9 }
  0x8e   : > { %p908_p4 = por %p907_p6, %p906_p2 }
  0x90   : > { %434 = vrot.lane.b32.xlu0 %v1312_v6, %s1028_s10  ;;  %437 = vrot.lane.b32.xlu1 %v1314_v7, %s1028_s10  ;;  %p909_p5 = pnand %p908_p4, %p902_p13 }
  0xf6   : > { %v364_v8 = vpop.permute.xlu0 %363  ;;  %v370_v9 = vpop.permute.xlu1 %369 }
  0xf7   : > { %v365_v10 = vsel %vm362_vm0, %v364_v8, %v1288_v0  ;;  %v371_v11 = vsel %vm362_vm0, %v370_v9, %v1290_v1 }
  0xf8   : > { %375 = vrot.lane.b32.xlu0 %v365_v10, %s1028_s10 }
  0xfa   : > { %v367_v12 = vpop.permute.xlu0 %366  ;;  %v373_v13 = vpop.permute.xlu1 %372 }
  0xfb   : > { %v368_v14 = vsel %vm362_vm0, %v367_v12, %v1296_v2  ;;  %v374_v15 = vsel %vm362_vm0, %v373_v13, %v1298_v3 }
  0xfc   : > { %379 = vrot.lane.b32.xlu0 %v371_v11, %s1028_s10  ;;  %377 = vrot.lane.b32.xlu1 %v368_v14, %s1028_s10 }
  0xfe   : > { %v429_v16 = vpop.permute.xlu0 %428  ;;  %v432_v17 = vpop.permute.xlu1 %431 }
  0xff   : > { %v430_v18 = vsel %vm362_vm0, %v429_v16, %v1304_v4  ;;  %v433_v19 = vsel %vm362_vm0, %v432_v17, %v1306_v5 }
 0x100   : > { %381 = vrot.lane.b32.xlu1 %v374_v15, %s1028_s10  ;;  %440 = vrot.lane.b32.xlu0 %v430_v18, %s1028_s10 }
 0x102   : > { %v435_v20 = vpop.permute.xlu0 %434  ;;  %v438_v21 = vpop.permute.xlu1 %437 }
 0x103   : > { %v436_v22 = vsel %vm362_vm0, %v435_v20, %v1312_v6  ;;  %v439_v23 = vsel %vm362_vm0, %v438_v21, %v1314_v7 }
 0x104   : > { %442 = vrot.lane.b32.xlu1 %v433_v19, %s1028_s10  ;;  %444 = vrot.lane.b32.xlu0 %v436_v22, %s1028_s10 }
 0x108   : > { %446 = vrot.lane.b32.xlu1 %v439_v23, %s1028_s10  ;;  %392 = vrot.lane.b32.xlu0 %v356_v24, %s1029_s24 }
 0x16a   : > { %v376_v25 = vpop.permute.xlu0 %375 }
 0x16b   : > { %v383_v31 = vsel %vm362_vm0, %v376_v25, %v1288_v0  ;;  %v452_v0 = vmul.f32 %v1304_v4, %v357_v50 }
 0x16e   : > { %v380_v26 = vpop.permute.xlu0 %379  ;;  %v378_v27 = vpop.permute.xlu1 %377 }
 0x16f   : > { %v384_v32 = vsel %vm362_vm0, %v378_v27, %v1296_v2  ;;  %v385_v38 = vsel %vm362_vm0, %v380_v26, %v1290_v1 }
 0x172   : > { %v441_v28 = vpop.permute.xlu0 %440  ;;  %v382_v29 = vpop.permute.xlu1 %381 }
 0x173   : > { %v386_v37 = vsel %vm362_vm0, %v382_v29, %v1298_v3  ;;  %v448_v43 = vsel %vm362_vm0, %v441_v28, %v1304_v4 }
 0x176   : > { %v445_v30 = vpop.permute.xlu0 %444  ;;  %v443_v34 = vpop.permute.xlu1 %442 }
 0x177   : > { %v449_v41 = vsel %vm362_vm0, %v443_v34, %v1306_v5  ;;  %v450_v47 = vsel %vm362_vm0, %v445_v30, %v1312_v6 }
 0x17a   : > { %v393_v33 = vpop.permute.xlu0 %392  ;;  %v447_v42 = vpop.permute.xlu1 %446 }
 0x17b   : > { %v396_v35 = vmul.f32 %v393_v33, %v384_v32  ;;  %v395_v36 = vmul.f32 %v393_v33, %v383_v31  ;;  %v398_v39 = vmul.f32 %v393_v33, %v386_v37  ;;  %v397_v40 = vmul.f32 %v393_v33, %v385_v38 }
 0x17c   : > { %v457_v44 = vmul.f32 %v449_v41, %v393_v33  ;;  %v456_v45 = vmul.f32 %v448_v43, %v393_v33  ;;  %v451_v46 = vsel %vm362_vm0, %v447_v42, %v1314_v7  ;;  %v458_v49 = vmul.f32 %v450_v47, %v393_v33 }
 0x17d   : > { %405 = vrot.lane.b32.xlu0 %v396_v35, %s1030_s28  ;;  %403 = vrot.lane.b32.xlu1 %v395_v36, %s1030_s28  ;;  %v459_v48 = vmul.f32 %v451_v46, %v393_v33 }
 0x181   : > { %409 = vrot.lane.b32.xlu0 %v398_v39, %s1030_s28  ;;  %407 = vrot.lane.b32.xlu1 %v397_v40, %s1030_s28 }
 0x185   : > { %466 = vrot.lane.b32.xlu0 %v457_v44, %s1030_s28  ;;  %464 = vrot.lane.b32.xlu1 %v456_v45, %s1030_s28 }
 0x189   : > { %470 = vrot.lane.b32.xlu0 %v459_v48, %s1030_s28  ;;  %468 = vrot.lane.b32.xlu1 %v458_v49, %s1030_s28 }
 0x1ef   : > { %v406_v53 = vpop.permute.xlu0 %405  ;;  %v404_v54 = vpop.permute.xlu1 %403 }
 0x1f0   : > { %v416_v55 = vadd.f32 %v406_v53, %v388_v51  ;;  %v415_v56 = vadd.f32 %v404_v54, %v387_v52 }
 0x1f2   : > { %421 = vst.msk [vmem:[%s340_s15 + $0x8] sm:$0xff] %vm419_vm1, %v416_v55  ;;  %420 = vst.msk [vmem:[%s340_s15] sm:$0xff] %vm419_vm1, %v415_v56 }
 0x1f3   : > { %v410_v59 = vpop.permute.xlu0 %409  ;;  %v408_v60 = vpop.permute.xlu1 %407 }
 0x1f4   : > { %v418_v61 = vadd.f32 %v410_v59, %v390_v57  ;;  %v417_v62 = vadd.f32 %v408_v60, %v389_v58 }
 0x1f6   : > { %423 = vst.msk [vmem:[%s340_s15 + $0x18] sm:$0xff] %vm419_vm1, %v418_v61  ;;  %422 = vst.msk [vmem:[%s340_s15 + $0x10] sm:$0xff] %vm419_vm1, %v417_v62 }
 0x1f7   : > { %v467_v1 = vpop.permute.xlu0 %466  ;;  %v465_v2 = vpop.permute.xlu1 %464 }
 0x1f8   : > { %912 = shalt.err (!%p909_p5)
}
 0x1f9   : > { %s913_s16 = scalar_lea.hbm %s1378_s13, 512  ;;  %s917_s28 = scalar_lea.hbm %s1481_s4, 1024 }
 0x1fa   : > { %p914_p11 = scmp.ne.s32.totalorder %s1378_s13, %s913_s16  ;;  %p918_p10 = scmp.lt.u32.totalorder %s1378_s13, %s1481_s4 }
 0x1fb   : > { %p919_p9 = scmp.lt.u32.totalorder %s917_s28, %s913_s16  ;;  %p921_p3 = scmp.lt.u32.totalorder %s913_s16, %s1378_s13 }
 0x1fc   : > { %p915_p1 = pnand %p914_p11, %p1512_p7 }
 0x1fd   : > { %p920_p0 = por %p919_p9, %p918_p10 }
 0x1fe   : > { %p916_p12 = pneg %p915_p1 }
 0x1ff   : > { %p922_p8 = por %p921_p3, %p920_p0 }
 0x201   : > { %p923_p13 = pnand %p922_p8, %p916_p12 }
 0x203   : > { %926 = shalt.err (!%p923_p13)
}
 0x204   : > { %s1032_s15 = smov 128   ;;  %s1033_s0 = smov 8   ;;  %v477_v3 = vadd.f32 %v467_v1, %v453_v63  ;;  %v476_v4 = vadd.f32 %v465_v2, %v452_v0  ;;  %v455_v5 = vmul.f32 %v1314_v7, %v357_v50  ;;  %v454_v8 = vmul.f32 %v1312_v6, %v357_v50  ;;  %v471_v9 = vpop.permute.xlu0 %470  ;;  %v469_v10 = vpop.permute.xlu1 %468 }
 0x205   : > { %729 = dma.vmem_to_hbm [thread:$0]  (%p1512_p7), %s1369_s25, 512, %s1378_s13, %s485_s17, %s1032_s15, %s1032_s15, %s1033_s0  }
 0x206   : > { %s347_s26 = scalar_lea.vmem [#allocation9], %s1270_s27  ;;  %v479_v11 = vadd.f32 %v471_v9, %v455_v5  ;;  %v478_v12 = vadd.f32 %v469_v10, %v454_v8  ;;  %s1423_s13 = scalar_lea.hbm %s1482_s5, %s719_s8 }
 0x207   : > { %s521_s9 = sshll.u32 %s347_s26, 4  ;;  %481 = vst.msk [vmem:[%s347_s26 + $0x8] sm:$0xff] %vm419_vm1, %v477_v3  ;;  %480 = vst.msk [vmem:[%s347_s26] sm:$0xff] %vm419_vm1, %v476_v4  ;;  %s490_s17 = scalar_lea.sflag [#allocation10], %s1267_s14  ;;  %s1416_s9 = int_to_ptr.vmem [resolvable:$true] %s521_s9 }
 0x208   : > { %483 = vst.msk [vmem:[%s347_s26 + $0x18] sm:$0xff] %vm419_vm1, %v479_v11  ;;  %482 = vst.msk [vmem:[%s347_s26 + $0x10] sm:$0xff] %vm419_vm1, %v478_v12  ;;  %s927_s12 = scalar_lea.vmem %s1416_s9, 512  ;;  %s1034_s6 = smov [#allocation9]  }
 0x209   : > { %p928_p2 = scmp.ne.s32.totalorder %s1416_s9, %s927_s12  ;;  %s931_s11 = sshll.u32 %s1034_s6, 4  ;;  %s932_s11 = int_to_ptr.vmem [resolvable:$false] %s931_s11 }
 0x20a   : > { %s933_s16 = scalar_lea.vmem %s932_s11, 1024  ;;  %p934_p5 = scmp.lt.s32.totalorder %s1416_s9, %s932_s11 }
 0x20b   : > { %p929_p6 = pnand %p928_p2, %p1512_p7  ;;  %p935_p11 = scmp.lt.s32.totalorder %s933_s16, %s927_s12 }
 0x20d   : > { %p930_p4 = pneg %p929_p6  ;;  %p936_p1 = por %p935_p11, %p934_p5 }
 0x20f   : > { %p937_p12 = pnand %p936_p1, %p930_p4 }
 0x211   : > { %940 = shalt.err (!%p937_p12)
}
 0x212   : > { %s941_s21 = scalar_lea.hbm %s1423_s13, 512  ;;  %s945_s24 = scalar_lea.hbm %s1482_s5, 1024 }
 0x213   : > { %p942_p10 = scmp.ne.s32.totalorder %s1423_s13, %s941_s21  ;;  %p946_p3 = scmp.lt.u32.totalorder %s1423_s13, %s1482_s5 }
 0x214   : > { %p947_p8 = scmp.lt.u32.totalorder %s945_s24, %s941_s21  ;;  %p949_p2 = scmp.lt.u32.totalorder %s941_s21, %s1423_s13 }
 0x215   : > { %p943_p9 = pnand %p942_p10, %p1512_p7 }
 0x216   : > { %p948_p13 = por %p947_p8, %p946_p3 }
 0x217   : > { %p944_p0 = pneg %p943_p9 }
 0x218   : > { %p950_p6 = por %p949_p2, %p948_p13 }
 0x21a   : > { %p951_p4 = pnand %p950_p6, %p944_p0 }
 0x21c   : > { %954 = shalt.err (!%p951_p4)
}
 0x21d   : > { %730 = dma.vmem_to_hbm [thread:$0]  (%p1512_p7), %s1416_s9, 512, %s1423_s13, %s490_s17, %s1032_s15, %s1032_s15, %s1033_s0  }
 0x21e PF: > { %s536_s2 = sand.u32 1, %s1001_s18   ;;  %p1513_p5 = scmp.ne.s32.totalorder %s1495_s30, 0 }
 0x21f   : > { %p1514_p11 = scmp.ge.s32.totalorder %s1021_s23, 2  ;;  %s537_s26 = scalar_lea.sflag [#allocation4], %s536_s2 }
 0x221   : > { %p745_p1 = pnand %p1514_p11, %p1513_p5 }
 0x223   : > { %992 = dma.done.wait (!%p745_p1), %s537_s26, 512  }
 0x224   : > { %994 = vsyncadd (!%p745_p1), %s537_s26, 4294966784  ;;  %s546_s29 = scalar_lea.sflag [#allocation10], %s536_s2 }
 0x225   : > { %996 = dma.done.wait (!%p745_p1), %s546_s29, 512  }
 0x226   : > { %998 = vsyncadd (!%p745_p1), %s546_s29, 4294966784  ;;  %s28_s23 = sadd.s32 1, %s1021_s23   ;;  %s1515_s14 = sld [smem:[#allocation17_spill]] }
 0x227   : > { %p25_p12 = scmp.ge.s32.totalorder %s28_s23, 4   ;;  %s1516_s15 = sld [smem:[#allocation16_spill]] }
 0x228   : > { %s1517_s18 = smov %s1005_s19  ;;  %s1518_s19 = smov %s1009_s20 }
 0x229   : > { %s1520_s21 = smov %s1017_s22  ;;  %27 = sbr.rel (!%p25_p12) target bundleno = 13 (0xd), region = 119 }
 0x22c   : > { %s1519_s20 = smov %s1515_s14 }
 0x22d   : > { %s1521_s22 = smov %s1516_s15 }
 0x230   :  { %551 = vsyncpa [#allocation3], 1 }
 0x231   :  { %553 = vsyncpa [#allocation3 + $0x1], 1 }
 0x232   :  { %554 = vsyncpa [#allocation6], 1 }
 0x233   :  { %556 = vsyncpa [#allocation6 + $0x1], 1 }
 0x234   :  { %557 = vsyncpa [#allocation4], 1 }
 0x235   :  { %559 = vsyncpa [#allocation4 + $0x1], 1 }
 0x236   :  { %560 = vsyncpa [#allocation10], 1 }
 0x237   :  { %562 = vsyncpa [#allocation10 + $0x1], 1 }

</bundles_post_ra>
